<compile_context>
chip_gen: v7x
topology: tpu7x:2x2x1
jax: 0.10.0
libtpu: 0.0.40
codegen_flags: <defaults>
</compile_context>

<pallas_src>
import jax
import jax.numpy as jnp
from jax.experimental import pallas as pl
from jax.experimental.pallas import tpu as pltpu

_LANES = 128


def ph_linear_kernel(x_ref, w_ref, b_ref, o_ref):
    # y = w * x + b  (Linear(1,1) reduces to a scalar affine transform).
    # w_ref / b_ref are (1, 128) rows broadcast over the sublane axis.
    o_ref[...] = x_ref[...] * w_ref[...] + b_ref[...]


def ph_model_forward(x, weight, bias, *, tm=512):
    """PHModel.forward: nn.Linear(1, 1) applied to x of shape [..., 1].

    weight: [1, 1] (PyTorch layout), bias: [1].
    Returns an array with the same shape/dtype as x.
    """
    orig_shape = x.shape
    orig_dtype = x.dtype

    flat = x.reshape(-1).astype(jnp.float32)
    total = flat.shape[0]

    # Lay the flat data out as a lane-dense [rows, 128] slab.
    rows = max(1, pl.cdiv(total, _LANES))
    rows8 = ((rows + 7) // 8) * 8                  # sublane multiple
    tm_eff = max(8, min(tm, rows8))
    tm_eff = (tm_eff // 8) * 8                     # keep a multiple of 8
    rows_pad = ((rows8 + tm_eff - 1) // tm_eff) * tm_eff
    padded = rows_pad * _LANES

    flat_p = jnp.pad(flat, (0, padded - total))
    x2d = flat_p.reshape(rows_pad, _LANES)

    # Broadcast the scalar weight/bias to a single lane-dense row (512 B each).
    w_row = jnp.broadcast_to(weight.reshape(1, 1).astype(jnp.float32), (1, _LANES))
    b_row = jnp.broadcast_to(bias.reshape(1, 1).astype(jnp.float32), (1, _LANES))

    grid = (rows_pad // tm_eff,)

    out2d = pl.pallas_call(
        ph_linear_kernel,
        out_shape=jax.ShapeDtypeStruct((rows_pad, _LANES), jnp.float32),
        grid_spec=pltpu.PrefetchScalarGridSpec(
            num_scalar_prefetch=0,
            grid=grid,
            in_specs=[
                pl.BlockSpec((tm_eff, _LANES), lambda i: (i, 0)),  # x row tile
                pl.BlockSpec((1, _LANES), lambda i: (0, 0)),       # weight row
                pl.BlockSpec((1, _LANES), lambda i: (0, 0)),       # bias row
            ],
            out_specs=pl.BlockSpec((tm_eff, _LANES), lambda i: (i, 0)),
        ),
        compiler_params=pltpu.CompilerParams(
            dimension_semantics=("parallel",),     # shard rows across TCs on v7x
        ),
    )(x2d, w_row, b_row)

    out_flat = out2d.reshape(-1)[:total]
    return out_flat.reshape(orig_shape).astype(orig_dtype)


def reference(x, weight, bias):
    # PyTorch nn.Linear: y = x @ W^T + b
    return jnp.matmul(x, weight.T) + bias


if __name__ == "__main__":
    # Small shapes consistent with the module: batch=2, seq=8, in_features=1.
    B, S, F = 2, 8, 1

    key = jax.random.PRNGKey(0)
    k_x, k_w, k_b = jax.random.split(key, 3)

    x = jax.random.normal(k_x, (B, S, F), dtype=jnp.float32)
    # PyTorch-Linear-like init: U(-1/sqrt(in), 1/sqrt(in)) with in_features=1.
    weight = jax.random.uniform(k_w, (1, 1), minval=-1.0, maxval=1.0, dtype=jnp.float32)
    bias = jax.random.uniform(k_b, (1,), minval=-1.0, maxval=1.0, dtype=jnp.float32)

    out = ph_model_forward(x, weight, bias)
    out = jax.block_until_ready(out)

    ref = reference(x, weight, bias)
    assert out.shape == (B, S, F)
    assert jnp.allclose(out, ref, atol=1e-6, rtol=1e-6), "mismatch vs pure-JAX reference"

    print("KERNEL_OK")
</pallas_src>

<mosaic_0001>
module attributes {stable_mosaic.version = 11 : i64} {
  func.func @ph_linear_kernel(%arg0: i32, %arg1: memref<8x128xf32, #tpu.memory_space<vmem>>, %arg2: memref<1x128xf32, #tpu.memory_space<vmem>>, %arg3: memref<1x128xf32, #tpu.memory_space<vmem>>, %arg4: memref<8x128xf32, #tpu.memory_space<vmem>>) attributes {dimension_semantics = [#tpu.dimension_semantics<parallel>], iteration_bounds = array<i64: 1>, scalar_prefetch = 0 : i64, scratch_operands = 0 : i64, tpu.core_type = #tpu.core_type<tc>, window_params = [{transform_indices = @transform_0, window_bounds = array<i64: 8, 128>}, {pipeline_mode = #tpu.pipeline_mode<synchronous>, transform_indices = @transform_1, window_bounds = array<i64: 1, 128>}, {pipeline_mode = #tpu.pipeline_mode<synchronous>, transform_indices = @transform_2, window_bounds = array<i64: 1, 128>}, {transform_indices = @transform_3, window_bounds = array<i64: 8, 128>}]} {
    %c0 = arith.constant 0 : index
    %c0_0 = arith.constant 0 : index
    %0 = vector.load %arg1[%c0, %c0_0] : memref<8x128xf32, #tpu.memory_space<vmem>>, vector<8x128xf32>
    %c0_1 = arith.constant 0 : index
    %c0_2 = arith.constant 0 : index
    %1 = vector.load %arg2[%c0_1, %c0_2] : memref<1x128xf32, #tpu.memory_space<vmem>>, vector<1x128xf32>
    %2 = vector.broadcast %1 : vector<1x128xf32> to vector<8x128xf32>
    %3 = arith.mulf %0, %2 : vector<8x128xf32>
    %c0_3 = arith.constant 0 : index
    %c0_4 = arith.constant 0 : index
    %4 = vector.load %arg3[%c0_3, %c0_4] : memref<1x128xf32, #tpu.memory_space<vmem>>, vector<1x128xf32>
    %5 = vector.broadcast %4 : vector<1x128xf32> to vector<8x128xf32>
    %6 = arith.addf %3, %5 : vector<8x128xf32>
    %c0_5 = arith.constant 0 : index
    %c0_6 = arith.constant 0 : index
    %7 = vector.load %arg4[%c0_5, %c0_6] : memref<8x128xf32, #tpu.memory_space<vmem>>, vector<8x128xf32>
    tpu.vector_store %arg4[%c0_5, %c0_6], %6 {strides = array<i32>} : memref<8x128xf32, #tpu.memory_space<vmem>>, vector<8x128xf32>,
    return
  }
  func.func @transform_0(%arg0: i32) -> (i32, i32) {
    %c0_i32 = arith.constant 0 : i32
    %c0_i32_0 = arith.constant 0 : i32
    return %arg0, %c0_i32 : i32, i32
  }
  func.func @transform_1(%arg0: i32) -> (i32, i32) {
    %c0_i32 = arith.constant 0 : i32
    %c0_i32_0 = arith.constant 0 : i32
    %c0_i32_1 = arith.constant 0 : i32
    return %c0_i32, %c0_i32_0 : i32, i32
  }
  func.func @transform_2(%arg0: i32) -> (i32, i32) {
    %c0_i32 = arith.constant 0 : i32
    %c0_i32_0 = arith.constant 0 : i32
    %c0_i32_1 = arith.constant 0 : i32
    return %c0_i32, %c0_i32_0 : i32, i32
  }
  func.func @transform_3(%arg0: i32) -> (i32, i32) {
    %c0_i32 = arith.constant 0 : i32
    %c0_i32_0 = arith.constant 0 : i32
    return %arg0, %c0_i32 : i32, i32
  }
}

</mosaic_0001>

<bundles_post_ra>
// kernel: tpu_custom_call.1
= control target key start
LH: loop header
LB: loop body
LE: loop exit
PB: predicated region body
PF: predicated region fallthrough
CT: control target
= control target key end

     0   :  { %8 = vsyncpa [#allocation3], 0  ;;  %s164_s0 = inlined_call_operand.hbm [shape: f32[8,128], index: 0, kind: input, shape index: {}]   ;;  %s165_s1 = inlined_call_operand.vmem [shape: f32[1,128], index: 1, kind: input, shape index: {}]   ;;  %s166_s2 = inlined_call_operand.vmem [shape: f32[1,128], index: 2, kind: input, shape index: {}]   ;;  %s167_s3 = inlined_call_operand.hbm [shape: f32[8,128], index: 3, kind: output, shape index: {}]  }
   0x1   :  { %9 = vsyncpa [#allocation4], 0  ;;  %s112_s12 = smov [#allocation2]   ;;  %s64_s16 = scalar_lea.hbm %s164_s0, 128 }
   0x2   :  { %s16_s13 = sshll.u32 %s112_s12, 4  ;;  %p65_p0 = scmp.ne.s32.totalorder %s164_s0, %s64_s16  ;;  %s17_s13 = int_to_ptr.vmem [resolvable:$true] %s16_s13 }
   0x3   :  { %p68_p1 = scmp.lt.u32.totalorder %s64_s16, %s164_s0 }
   0x5   :  { %p70_p2 = pnand %p68_p1, %p65_p0 }
   0x7   :  { %73 = shalt.err (!%p70_p2)
}
   0x8   :  { %s74_s21 = scalar_lea.vmem %s17_s13, 128  ;;  %p79_p4 = scmp.lt.s32.totalorder %s17_s13, %s17_s13 }
   0x9   :  { %p75_p3 = scmp.ne.s32.totalorder %s17_s13, %s74_s21  ;;  %p80_p5 = scmp.lt.s32.totalorder %s74_s21, %s74_s21 }
   0xb   :  { %p81_p6 = por %p80_p5, %p79_p4 }
   0xd   :  { %p82_p7 = pnand %p81_p6, %p75_p3 }
   0xf   :  { %85 = shalt.err (!%p82_p7)
}
  0x10   :  { %19 = dma.hbm_to_vmem [thread:$0]  %s164_s0, 128, %s17_s13, [#allocation3]  }
  0x11   :  { %108 = dma.done.wait [#allocation3], 128  }
  0x12   :  { %109 = vsyncadd [#allocation3], 4294967168  ;;  %v27_v0 = vld [vmem:[#allocation2] sm:$0xff]  ;;  %s113_s28 = smov [#allocation5]  }
  0x13   :  { %v60_v1 = vld [vmem:[%s165_s1] ss:$0 sm:$0xff]  ;;  %s51_s29 = sshll.u32 %s113_s28, 4  ;;  %s52_s29 = int_to_ptr.vmem [resolvable:$true] %s51_s29 }
  0x14   :  { %v61_v2 = vld [vmem:[%s166_s2] ss:$0 sm:$0xff]  ;;  %v35_v3 = vmul.f32 %v60_v1, %v27_v0  ;;  %s86_s30 = scalar_lea.vmem %s52_s29, 128  ;;  %p91_p9 = scmp.lt.s32.totalorder %s52_s29, %s52_s29 }
  0x15   :  { %p87_p8 = scmp.ne.s32.totalorder %s52_s29, %s86_s30  ;;  %p92_p10 = scmp.lt.s32.totalorder %s86_s30, %s86_s30 }
  0x16   :  { %v43_v4 = vadd.f32 %v61_v2, %v35_v3 }
  0x17   :  { %p93_p11 = por %p92_p10, %p91_p9 }
  0x18   :  { %44 = vst [vmem:[#allocation5] sm:$0xff] %v43_v4 }
  0x19   :  { %p94_p12 = pnand %p93_p11, %p87_p8 }
  0x1b   :  { %97 = shalt.err (!%p94_p12)
}
  0x1c   :  { %s98_s1 = scalar_lea.hbm %s167_s3, 128 }
  0x1d   :  { %p99_p13 = scmp.ne.s32.totalorder %s167_s3, %s98_s1  ;;  %p102_p0 = scmp.lt.u32.totalorder %s98_s1, %s167_s3 }
  0x1f   :  { %p104_p1 = pnand %p102_p0, %p99_p13 }
  0x21   :  { %107 = shalt.err (!%p104_p1)
}
  0x22   :  { %54 = dma.vmem_to_hbm [thread:$0]  %s52_s29, 128, %s167_s3, [#allocation4]  }
  0x23   :  { %110 = dma.done.wait [#allocation4], 128  }
  0x24   :  { %111 = vsyncadd [#allocation4], 4294967168 }
  0x25   :  { %58 = vsyncpa [#allocation3], 1 }
  0x26   :  { %59 = vsyncpa [#allocation4], 1 }

</bundles_post_ra>
